<compile_context>
chip_gen: v5e
topology: v5e:2x2
jax: 0.10.0
libtpu: 0.0.40
codegen_flags: <defaults>
</compile_context>

<pallas_src>
import functools

import jax
import jax.numpy as jnp
from jax import lax
from jax.experimental import pallas as pl
from jax.experimental.pallas import tpu as pltpu

_LANE = 128


def _pooled_logreg_kernel(ids_ref, tab_ref, w_ref, bias_ref, o_ref, *,
                          block_b, seq_len, batch):
    # ids_ref  : SMEM int32 [2*B*L]      (scalar-prefetched; premise then hypothesis)
    # tab_ref  : VMEM f32   [V_pad, E_pad]  embedding table, resident
    # w_ref    : VMEM f32   [2, E_pad]      row 0: premise half, row 1: hypothesis half
    # bias_ref : SMEM f32   [1, 1]
    # o_ref    : VMEM f32   [1, 128]        lane-dense logits tile (first block_b lanes real)
    e_pad = tab_ref.shape[1]
    b0 = pl.program_id(0) * block_b

    wp = w_ref[0:1, :]                                  # [1, E_pad]
    wh = w_ref[1:2, :]                                  # [1, E_pad]
    bias = bias_ref[0, 0]
    lane = lax.broadcasted_iota(jnp.int32, (1, _LANE), 1)

    def batch_body(bb, out_row):
        base_p = (b0 + bb) * seq_len
        base_h = batch * seq_len + (b0 + bb) * seq_len

        def seq_body(l, carry):
            pm, hm = carry
            p_tok = ids_ref[base_p + l]                 # SMEM scalar reads
            h_tok = ids_ref[base_h + l]
            pm = jnp.maximum(pm, tab_ref[pl.ds(p_tok, 1), :])   # gather row in-kernel
            hm = jnp.maximum(hm, tab_ref[pl.ds(h_tok, 1), :])
            return pm, hm

        neg_inf = jnp.full((1, e_pad), -jnp.inf, dtype=jnp.float32)
        pm, hm = lax.fori_loop(0, seq_len, seq_body, (neg_inf, neg_inf),
                               unroll=True)
        # VPU multiply + cross-lane reduce (replaces the N=1 MXU matvec).
        logit = jnp.sum(pm * wp + hm * wh, axis=-1, keepdims=True)   # [1, 1]
        return jnp.where(lane == bb, logit, out_row)

    out_row = lax.fori_loop(0, block_b, batch_body,
                            jnp.zeros((1, _LANE), jnp.float32))
    o_ref[...] = jax.nn.sigmoid(out_row + bias)


def pooled_logistic_regression(premise, hypothesis, emb_table, w, b, *,
                               block_b=8):
    """premise/hypothesis: int32 [B, L]; emb_table: [V, E]; w: [1, 2E]; b: [1]."""
    B, L = premise.shape
    V, E = emb_table.shape
    assert hypothesis.shape == (B, L)
    assert 0 < block_b <= _LANE and B % block_b == 0
    grid_b = B // block_b

    e_pad = ((E + _LANE - 1) // _LANE) * _LANE
    v_pad = ((V + 7) // 8) * 8

    # Zero-pad table & split the Linear(2E,1) weight into premise/hyp halves.
    # Zero weight lanes make the padded columns contribute exactly 0.
    tab = jnp.zeros((v_pad, e_pad), jnp.float32)
    tab = tab.at[:V, :E].set(emb_table.astype(jnp.float32))
    w2 = jnp.zeros((2, e_pad), jnp.float32)
    w2 = w2.at[0, :E].set(w[0, :E].astype(jnp.float32))
    w2 = w2.at[1, :E].set(w[0, E:].astype(jnp.float32))
    bias = b.reshape(1, 1).astype(jnp.float32)

    # Pack both id tensors into one flat int32 array for SMEM (premise, then hyp).
    ids = jnp.stack([premise, hypothesis], axis=0).astype(jnp.int32).reshape(-1)

    kernel = functools.partial(_pooled_logreg_kernel,
                               block_b=block_b, seq_len=L, batch=B)

    out = pl.pallas_call(
        kernel,
        out_shape=jax.ShapeDtypeStruct((1, grid_b * _LANE), jnp.float32),
        grid_spec=pltpu.PrefetchScalarGridSpec(
            num_scalar_prefetch=1,                       # ids -> SMEM
            grid=(grid_b,),
            in_specs=[
                pl.BlockSpec((v_pad, e_pad), lambda i, ids: (0, 0)),   # table
                pl.BlockSpec((2, e_pad), lambda i, ids: (0, 0)),       # weights
                pl.BlockSpec(memory_space=pltpu.SMEM),                 # bias
            ],
            out_specs=pl.BlockSpec((1, _LANE), lambda i, ids: (0, i)),
        ),
        compiler_params=pltpu.CompilerParams(
            dimension_semantics=("parallel",)),
    )(ids, tab, w2, bias)

    # Slice the real logits out of each 128-wide lane tile -> [B].
    return out.reshape(grid_b, _LANE)[:, :block_b].reshape(-1)


if __name__ == "__main__":
    key = jax.random.PRNGKey(0)
    k_emb, k_w, k_b, k_p, k_h = jax.random.split(key, 5)

    VOCAB, E = 100, 32
    B, L = 16, 16

    # Deterministic synthetic parameters (not a checkpoint load).
    emb_table = jax.random.normal(k_emb, (VOCAB, E), dtype=jnp.float32)
    lim = 1.0 / jnp.sqrt(2.0 * E)
    w = jax.random.uniform(k_w, (1, 2 * E), minval=-lim, maxval=lim,
                           dtype=jnp.float32)
    b = jax.random.uniform(k_b, (1,), minval=-lim, maxval=lim,
                           dtype=jnp.float32)

    premise = jax.random.randint(k_p, (B, L), 0, VOCAB, dtype=jnp.int32)
    hypothesis = jax.random.randint(k_h, (B, L), 0, VOCAB, dtype=jnp.int32)

    out = pooled_logistic_regression(premise, hypothesis, emb_table, w, b,
                                     block_b=8)
    out = jax.block_until_ready(out)

    # Pure-JAX reference check.
    p_emb = jnp.take(emb_table, premise, axis=0)
    h_emb = jnp.take(emb_table, hypothesis, axis=0)
    x = jnp.concatenate([p_emb.max(axis=1), h_emb.max(axis=1)], axis=1)
    ref = jax.nn.sigmoid(x @ w.T + b).reshape(-1)

    assert out.shape == (B,)
    assert jnp.allclose(out, ref, atol=1e-5, rtol=1e-5)

    print("KERNEL_OK")
</pallas_src>

<mosaic_0001>
module attributes {stable_mosaic.version = 11 : i64} {
  func.func @_pooled_logreg_kernel(%arg0: i32, %arg1: memref<512xi32, #tpu.memory_space<smem>>, %arg2: memref<104x128xf32, #tpu.memory_space<vmem>>, %arg3: memref<2x128xf32, #tpu.memory_space<vmem>>, %arg4: memref<1x1xf32, #tpu.memory_space<smem>>, %arg5: memref<1x128xf32, #tpu.memory_space<vmem>>) attributes {dimension_semantics = [#tpu.dimension_semantics<parallel>], iteration_bounds = array<i64: 2>, scalar_prefetch = 1 : i64, scratch_operands = 0 : i64, tpu.core_type = #tpu.core_type<tc>, window_params = [{pipeline_mode = #tpu.pipeline_mode<synchronous>, transform_indices = @transform_0, window_bounds = array<i64: 104, 128>}, {pipeline_mode = #tpu.pipeline_mode<synchronous>, transform_indices = @transform_1, window_bounds = array<i64: 2, 128>}, {transform_indices = @transform_2, window_bounds = array<i64: 1, 1>}, {transform_indices = @transform_3, window_bounds = array<i64: 1, 128>}]} {
    %c8_i32 = arith.constant 8 : i32
    %0 = arith.muli %arg0, %c8_i32 : i32
    %c0 = arith.constant 0 : index
    %c0_0 = arith.constant 0 : index
    %1 = vector.load %arg3[%c0, %c0_0] : memref<2x128xf32, #tpu.memory_space<vmem>>, vector<1x128xf32>
    %c1 = arith.constant 1 : index
    %c0_1 = arith.constant 0 : index
    %2 = vector.load %arg3[%c1, %c0_1] : memref<2x128xf32, #tpu.memory_space<vmem>>, vector<1x128xf32>
    %c0_2 = arith.constant 0 : index
    %c0_3 = arith.constant 0 : index
    %3 = memref.load %arg4[%c0_2, %c0_3] : memref<1x1xf32, #tpu.memory_space<smem>>
    %4 = tpu.iota {dimensions = array<i32: 1>} : vector<1x128xi32>
    %cst = arith.constant 0.000000e+00 : f32
    %5 = vector.broadcast %cst : f32 to vector<1x128xf32>
    %c0_i32 = arith.constant 0 : i32
    %c8_i32_4 = arith.constant 8 : i32
    %6 = arith.addi %c0_i32, %c8_i32_4 : i32
    %c1_i32 = arith.constant 1 : i32
    %7 = scf.for %arg6 = %c0_i32 to %6 step %c1_i32 iter_args(%arg7 = %5) -> (vector<1x128xf32>)  : i32 {
      %16 = arith.addi %0, %arg6 : i32
      %c16_i32 = arith.constant 16 : i32
      %17 = arith.muli %16, %c16_i32 : i32
      %18 = arith.addi %0, %arg6 : i32
      %c16_i32_9 = arith.constant 16 : i32
      %19 = arith.muli %18, %c16_i32_9 : i32
      %c256_i32 = arith.constant 256 : i32
      %20 = arith.addi %c256_i32, %19 : i32
      %cst_10 = arith.constant 0xFF800000 : f32
      %21 = vector.broadcast %cst_10 : f32 to vector<1x128xf32>
      %c0_i32_11 = arith.constant 0 : i32
      %22 = arith.addi %17, %c0_i32_11 : i32
      %23 = arith.index_cast %22 : i32 to index
      %24 = memref.load %arg1[%23] : memref<512xi32, #tpu.memory_space<smem>>
      %25 = arith.addi %20, %c0_i32_11 : i32
      %26 = arith.index_cast %25 : i32 to index
      %27 = memref.load %arg1[%26] : memref<512xi32, #tpu.memory_space<smem>>
      %28 = arith.index_cast %24 : i32 to index
      %c0_12 = arith.constant 0 : index
      %29 = vector.load %arg2[%28, %c0_12] : memref<104x128xf32, #tpu.memory_space<vmem>>, vector<1x128xf32>
      %30 = arith.maximumf %21, %29 : vector<1x128xf32>
      %31 = arith.index_cast %27 : i32 to index
      %c0_13 = arith.constant 0 : index
      %32 = vector.load %arg2[%31, %c0_13] : memref<104x128xf32, #tpu.memory_space<vmem>>, vector<1x128xf32>
      %33 = arith.maximumf %21, %32 : vector<1x128xf32>
      %c1_i32_14 = arith.constant 1 : i32
      %34 = arith.addi %17, %c1_i32_14 : i32
      %35 = arith.index_cast %34 : i32 to index
      %36 = memref.load %arg1[%35] : memref<512xi32, #tpu.memory_space<smem>>
      %37 = arith.addi %20, %c1_i32_14 : i32
      %38 = arith.index_cast %37 : i32 to index
      %39 = memref.load %arg1[%38] : memref<512xi32, #tpu.memory_space<smem>>
      %40 = arith.index_cast %36 : i32 to index
      %c0_15 = arith.constant 0 : index
      %41 = vector.load %arg2[%40, %c0_15] : memref<104x128xf32, #tpu.memory_space<vmem>>, vector<1x128xf32>
      %42 = arith.maximumf %30, %41 : vector<1x128xf32>
      %43 = arith.index_cast %39 : i32 to index
      %c0_16 = arith.constant 0 : index
      %44 = vector.load %arg2[%43, %c0_16] : memref<104x128xf32, #tpu.memory_space<vmem>>, vector<1x128xf32>
      %45 = arith.maximumf %33, %44 : vector<1x128xf32>
      %c2_i32 = arith.constant 2 : i32
      %46 = arith.addi %17, %c2_i32 : i32
      %47 = arith.index_cast %46 : i32 to index
      %48 = memref.load %arg1[%47] : memref<512xi32, #tpu.memory_space<smem>>
      %49 = arith.addi %20, %c2_i32 : i32
      %50 = arith.index_cast %49 : i32 to index
      %51 = memref.load %arg1[%50] : memref<512xi32, #tpu.memory_space<smem>>
      %52 = arith.index_cast %48 : i32 to index
      %c0_17 = arith.constant 0 : index
      %53 = vector.load %arg2[%52, %c0_17] : memref<104x128xf32, #tpu.memory_space<vmem>>, vector<1x128xf32>
      %54 = arith.maximumf %42, %53 : vector<1x128xf32>
      %55 = arith.index_cast %51 : i32 to index
      %c0_18 = arith.constant 0 : index
      %56 = vector.load %arg2[%55, %c0_18] : memref<104x128xf32, #tpu.memory_space<vmem>>, vector<1x128xf32>
      %57 = arith.maximumf %45, %56 : vector<1x128xf32>
      %c3_i32 = arith.constant 3 : i32
      %58 = arith.addi %17, %c3_i32 : i32
      %59 = arith.index_cast %58 : i32 to index
      %60 = memref.load %arg1[%59] : memref<512xi32, #tpu.memory_space<smem>>
      %61 = arith.addi %20, %c3_i32 : i32
      %62 = arith.index_cast %61 : i32 to index
      %63 = memref.load %arg1[%62] : memref<512xi32, #tpu.memory_space<smem>>
      %64 = arith.index_cast %60 : i32 to index
      %c0_19 = arith.constant 0 : index
      %65 = vector.load %arg2[%64, %c0_19] : memref<104x128xf32, #tpu.memory_space<vmem>>, vector<1x128xf32>
      %66 = arith.maximumf %54, %65 : vector<1x128xf32>
      %67 = arith.index_cast %63 : i32 to index
      %c0_20 = arith.constant 0 : index
      %68 = vector.load %arg2[%67, %c0_20] : memref<104x128xf32, #tpu.memory_space<vmem>>, vector<1x128xf32>
      %69 = arith.maximumf %57, %68 : vector<1x128xf32>
      %c4_i32 = arith.constant 4 : i32
      %70 = arith.addi %17, %c4_i32 : i32
      %71 = arith.index_cast %70 : i32 to index
      %72 = memref.load %arg1[%71] : memref<512xi32, #tpu.memory_space<smem>>
      %73 = arith.addi %20, %c4_i32 : i32
      %74 = arith.index_cast %73 : i32 to index
      %75 = memref.load %arg1[%74] : memref<512xi32, #tpu.memory_space<smem>>
      %76 = arith.index_cast %72 : i32 to index
      %c0_21 = arith.constant 0 : index
      %77 = vector.load %arg2[%76, %c0_21] : memref<104x128xf32, #tpu.memory_space<vmem>>, vector<1x128xf32>
      %78 = arith.maximumf %66, %77 : vector<1x128xf32>
      %79 = arith.index_cast %75 : i32 to index
      %c0_22 = arith.constant 0 : index
      %80 = vector.load %arg2[%79, %c0_22] : memref<104x128xf32, #tpu.memory_space<vmem>>, vector<1x128xf32>
      %81 = arith.maximumf %69, %80 : vector<1x128xf32>
      %c5_i32 = arith.constant 5 : i32
      %82 = arith.addi %17, %c5_i32 : i32
      %83 = arith.index_cast %82 : i32 to index
      %84 = memref.load %arg1[%83] : memref<512xi32, #tpu.memory_space<smem>>
      %85 = arith.addi %20, %c5_i32 : i32
      %86 = arith.index_cast %85 : i32 to index
      %87 = memref.load %arg1[%86] : memref<512xi32, #tpu.memory_space<smem>>
      %88 = arith.index_cast %84 : i32 to index
      %c0_23 = arith.constant 0 : index
      %89 = vector.load %arg2[%88, %c0_23] : memref<104x128xf32, #tpu.memory_space<vmem>>, vector<1x128xf32>
      %90 = arith.maximumf %78, %89 : vector<1x128xf32>
      %91 = arith.index_cast %87 : i32 to index
      %c0_24 = arith.constant 0 : index
      %92 = vector.load %arg2[%91, %c0_24] : memref<104x128xf32, #tpu.memory_space<vmem>>, vector<1x128xf32>
      %93 = arith.maximumf %81, %92 : vector<1x128xf32>
      %c6_i32 = arith.constant 6 : i32
      %94 = arith.addi %17, %c6_i32 : i32
      %95 = arith.index_cast %94 : i32 to index
      %96 = memref.load %arg1[%95] : memref<512xi32, #tpu.memory_space<smem>>
      %97 = arith.addi %20, %c6_i32 : i32
      %98 = arith.index_cast %97 : i32 to index
      %99 = memref.load %arg1[%98] : memref<512xi32, #tpu.memory_space<smem>>
      %100 = arith.index_cast %96 : i32 to index
      %c0_25 = arith.constant 0 : index
      %101 = vector.load %arg2[%100, %c0_25] : memref<104x128xf32, #tpu.memory_space<vmem>>, vector<1x128xf32>
      %102 = arith.maximumf %90, %101 : vector<1x128xf32>
      %103 = arith.index_cast %99 : i32 to index
      %c0_26 = arith.constant 0 : index
      %104 = vector.load %arg2[%103, %c0_26] : memref<104x128xf32, #tpu.memory_space<vmem>>, vector<1x128xf32>
      %105 = arith.maximumf %93, %104 : vector<1x128xf32>
      %c7_i32 = arith.constant 7 : i32
      %106 = arith.addi %17, %c7_i32 : i32
      %107 = arith.index_cast %106 : i32 to index
      %108 = memref.load %arg1[%107] : memref<512xi32, #tpu.memory_space<smem>>
      %109 = arith.addi %20, %c7_i32 : i32
      %110 = arith.index_cast %109 : i32 to index
      %111 = memref.load %arg1[%110] : memref<512xi32, #tpu.memory_space<smem>>
      %112 = arith.index_cast %108 : i32 to index
      %c0_27 = arith.constant 0 : index
      %113 = vector.load %arg2[%112, %c0_27] : memref<104x128xf32, #tpu.memory_space<vmem>>, vector<1x128xf32>
      %114 = arith.maximumf %102, %113 : vector<1x128xf32>
      %115 = arith.index_cast %111 : i32 to index
      %c0_28 = arith.constant 0 : index
      %116 = vector.load %arg2[%115, %c0_28] : memref<104x128xf32, #tpu.memory_space<vmem>>, vector<1x128xf32>
      %117 = arith.maximumf %105, %116 : vector<1x128xf32>
      %c8_i32_29 = arith.constant 8 : i32
      %118 = arith.addi %17, %c8_i32_29 : i32
      %119 = arith.index_cast %118 : i32 to index
      %120 = memref.load %arg1[%119] : memref<512xi32, #tpu.memory_space<smem>>
      %121 = arith.addi %20, %c8_i32_29 : i32
      %122 = arith.index_cast %121 : i32 to index
      %123 = memref.load %arg1[%122] : memref<512xi32, #tpu.memory_space<smem>>
      %124 = arith.index_cast %120 : i32 to index
      %c0_30 = arith.constant 0 : index
      %125 = vector.load %arg2[%124, %c0_30] : memref<104x128xf32, #tpu.memory_space<vmem>>, vector<1x128xf32>
      %126 = arith.maximumf %114, %125 : vector<1x128xf32>
      %127 = arith.index_cast %123 : i32 to index
      %c0_31 = arith.constant 0 : index
      %128 = vector.load %arg2[%127, %c0_31] : memref<104x128xf32, #tpu.memory_space<vmem>>, vector<1x128xf32>
      %129 = arith.maximumf %117, %128 : vector<1x128xf32>
      %c9_i32 = arith.constant 9 : i32
      %130 = arith.addi %17, %c9_i32 : i32
      %131 = arith.index_cast %130 : i32 to index
      %132 = memref.load %arg1[%131] : memref<512xi32, #tpu.memory_space<smem>>
      %133 = arith.addi %20, %c9_i32 : i32
      %134 = arith.index_cast %133 : i32 to index
      %135 = memref.load %arg1[%134] : memref<512xi32, #tpu.memory_space<smem>>
      %136 = arith.index_cast %132 : i32 to index
      %c0_32 = arith.constant 0 : index
      %137 = vector.load %arg2[%136, %c0_32] : memref<104x128xf32, #tpu.memory_space<vmem>>, vector<1x128xf32>
      %138 = arith.maximumf %126, %137 : vector<1x128xf32>
      %139 = arith.index_cast %135 : i32 to index
      %c0_33 = arith.constant 0 : index
      %140 = vector.load %arg2[%139, %c0_33] : memref<104x128xf32, #tpu.memory_space<vmem>>, vector<1x128xf32>
      %141 = arith.maximumf %129, %140 : vector<1x128xf32>
      %c10_i32 = arith.constant 10 : i32
      %142 = arith.addi %17, %c10_i32 : i32
      %143 = arith.index_cast %142 : i32 to index
      %144 = memref.load %arg1[%143] : memref<512xi32, #tpu.memory_space<smem>>
      %145 = arith.addi %20, %c10_i32 : i32
      %146 = arith.index_cast %145 : i32 to index
      %147 = memref.load %arg1[%146] : memref<512xi32, #tpu.memory_space<smem>>
      %148 = arith.index_cast %144 : i32 to index
      %c0_34 = arith.constant 0 : index
      %149 = vector.load %arg2[%148, %c0_34] : memref<104x128xf32, #tpu.memory_space<vmem>>, vector<1x128xf32>
      %150 = arith.maximumf %138, %149 : vector<1x128xf32>
      %151 = arith.index_cast %147 : i32 to index
      %c0_35 = arith.constant 0 : index
      %152 = vector.load %arg2[%151, %c0_35] : memref<104x128xf32, #tpu.memory_space<vmem>>, vector<1x128xf32>
      %153 = arith.maximumf %141, %152 : vector<1x128xf32>
      %c11_i32 = arith.constant 11 : i32
      %154 = arith.addi %17, %c11_i32 : i32
      %155 = arith.index_cast %154 : i32 to index
      %156 = memref.load %arg1[%155] : memref<512xi32, #tpu.memory_space<smem>>
      %157 = arith.addi %20, %c11_i32 : i32
      %158 = arith.index_cast %157 : i32 to index
      %159 = memref.load %arg1[%158] : memref<512xi32, #tpu.memory_space<smem>>
      %160 = arith.index_cast %156 : i32 to index
      %c0_36 = arith.constant 0 : index
      %161 = vector.load %arg2[%160, %c0_36] : memref<104x128xf32, #tpu.memory_space<vmem>>, vector<1x128xf32>
      %162 = arith.maximumf %150, %161 : vector<1x128xf32>
      %163 = arith.index_cast %159 : i32 to index
      %c0_37 = arith.constant 0 : index
      %164 = vector.load %arg2[%163, %c0_37] : memref<104x128xf32, #tpu.memory_space<vmem>>, vector<1x128xf32>
      %165 = arith.maximumf %153, %164 : vector<1x128xf32>
      %c12_i32 = arith.constant 12 : i32
      %166 = arith.addi %17, %c12_i32 : i32
      %167 = arith.index_cast %166 : i32 to index
      %168 = memref.load %arg1[%167] : memref<512xi32, #tpu.memory_space<smem>>
      %169 = arith.addi %20, %c12_i32 : i32
      %170 = arith.index_cast %169 : i32 to index
      %171 = memref.load %arg1[%170] : memref<512xi32, #tpu.memory_space<smem>>
      %172 = arith.index_cast %168 : i32 to index
      %c0_38 = arith.constant 0 : index
      %173 = vector.load %arg2[%172, %c0_38] : memref<104x128xf32, #tpu.memory_space<vmem>>, vector<1x128xf32>
      %174 = arith.maximumf %162, %173 : vector<1x128xf32>
      %175 = arith.index_cast %171 : i32 to index
      %c0_39 = arith.constant 0 : index
      %176 = vector.load %arg2[%175, %c0_39] : memref<104x128xf32, #tpu.memory_space<vmem>>, vector<1x128xf32>
      %177 = arith.maximumf %165, %176 : vector<1x128xf32>
      %c13_i32 = arith.constant 13 : i32
      %178 = arith.addi %17, %c13_i32 : i32
      %179 = arith.index_cast %178 : i32 to index
      %180 = memref.load %arg1[%179] : memref<512xi32, #tpu.memory_space<smem>>
      %181 = arith.addi %20, %c13_i32 : i32
      %182 = arith.index_cast %181 : i32 to index
      %183 = memref.load %arg1[%182] : memref<512xi32, #tpu.memory_space<smem>>
      %184 = arith.index_cast %180 : i32 to index
      %c0_40 = arith.constant 0 : index
      %185 = vector.load %arg2[%184, %c0_40] : memref<104x128xf32, #tpu.memory_space<vmem>>, vector<1x128xf32>
      %186 = arith.maximumf %174, %185 : vector<1x128xf32>
      %187 = arith.index_cast %183 : i32 to index
      %c0_41 = arith.constant 0 : index
      %188 = vector.load %arg2[%187, %c0_41] : memref<104x128xf32, #tpu.memory_space<vmem>>, vector<1x128xf32>
      %189 = arith.maximumf %177, %188 : vector<1x128xf32>
      %c14_i32 = arith.constant 14 : i32
      %190 = arith.addi %17, %c14_i32 : i32
      %191 = arith.index_cast %190 : i32 to index
      %192 = memref.load %arg1[%191] : memref<512xi32, #tpu.memory_space<smem>>
      %193 = arith.addi %20, %c14_i32 : i32
      %194 = arith.index_cast %193 : i32 to index
      %195 = memref.load %arg1[%194] : memref<512xi32, #tpu.memory_space<smem>>
      %196 = arith.index_cast %192 : i32 to index
      %c0_42 = arith.constant 0 : index
      %197 = vector.load %arg2[%196, %c0_42] : memref<104x128xf32, #tpu.memory_space<vmem>>, vector<1x128xf32>
      %198 = arith.maximumf %186, %197 : vector<1x128xf32>
      %199 = arith.index_cast %195 : i32 to index
      %c0_43 = arith.constant 0 : index
      %200 = vector.load %arg2[%199, %c0_43] : memref<104x128xf32, #tpu.memory_space<vmem>>, vector<1x128xf32>
      %201 = arith.maximumf %189, %200 : vector<1x128xf32>
      %c15_i32 = arith.constant 15 : i32
      %202 = arith.addi %17, %c15_i32 : i32
      %203 = arith.index_cast %202 : i32 to index
      %204 = memref.load %arg1[%203] : memref<512xi32, #tpu.memory_space<smem>>
      %205 = arith.addi %20, %c15_i32 : i32
      %206 = arith.index_cast %205 : i32 to index
      %207 = memref.load %arg1[%206] : memref<512xi32, #tpu.memory_space<smem>>
      %208 = arith.index_cast %204 : i32 to index
      %c0_44 = arith.constant 0 : index
      %209 = vector.load %arg2[%208, %c0_44] : memref<104x128xf32, #tpu.memory_space<vmem>>, vector<1x128xf32>
      %210 = arith.maximumf %198, %209 : vector<1x128xf32>
      %211 = arith.index_cast %207 : i32 to index
      %c0_45 = arith.constant 0 : index
      %212 = vector.load %arg2[%211, %c0_45] : memref<104x128xf32, #tpu.memory_space<vmem>>, vector<1x128xf32>
      %213 = arith.maximumf %201, %212 : vector<1x128xf32>
      %c16_i32_46 = arith.constant 16 : i32
      %214 = arith.mulf %210, %1 : vector<1x128xf32>
      %215 = arith.mulf %213, %2 : vector<1x128xf32>
      %216 = arith.addf %214, %215 : vector<1x128xf32>
      %cst_47 = arith.constant dense<0.000000e+00> : vector<1xf32>
      %217 = vector.multi_reduction <add>, %216, %cst_47 [1] : vector<1x128xf32> to vector<1xf32>
      %218 = vector.shape_cast %217 : vector<1xf32> to vector<1x1xf32>
      %219 = vector.broadcast %arg6 : i32 to vector<1x128xi32>
      %220 = arith.cmpi eq, %4, %219 : vector<1x128xi32>
      %221 = vector.shape_cast %218 : vector<1x1xf32> to vector<1x1xf32>
      %222 = vector.broadcast %221 : vector<1x1xf32> to vector<1x128xf32>
      %223 = arith.select %220, %222, %arg7 : vector<1x128xi1>, vector<1x128xf32>
      scf.yield %223 : vector<1x128xf32>
    }
    %c8_i32_5 = arith.constant 8 : i32
    %8 = vector.broadcast %3 : f32 to vector<1x128xf32>
    %9 = arith.addf %7, %8 : vector<1x128xf32>
    %10 = arith.negf %9 : vector<1x128xf32>
    %11 = math.exp %10 : vector<1x128xf32>
    %cst_6 = arith.constant 1.000000e+00 : f32
    %12 = vector.broadcast %cst_6 : f32 to vector<1x128xf32>
    %13 = arith.addf %12, %11 : vector<1x128xf32>
    %14 = arith.divf %12, %13 : vector<1x128xf32>
    %c0_7 = arith.constant 0 : index
    %c0_8 = arith.constant 0 : index
    %15 = vector.load %arg5[%c0_7, %c0_8] : memref<1x128xf32, #tpu.memory_space<vmem>>, vector<1x128xf32>
    tpu.vector_store %arg5[%c0_7, %c0_8], %14 {strides = array<i32>} : memref<1x128xf32, #tpu.memory_space<vmem>>, vector<1x128xf32>,
    return
  }
  func.func @transform_0(%arg0: i32, %arg1: memref<512xi32, #tpu.memory_space<smem>>) -> (i32, i32) {
    %c0_i32 = arith.constant 0 : i32
    %c0_i32_0 = arith.constant 0 : i32
    %c0_i32_1 = arith.constant 0 : i32
    return %c0_i32, %c0_i32_0 : i32, i32
  }
  func.func @transform_1(%arg0: i32, %arg1: memref<512xi32, #tpu.memory_space<smem>>) -> (i32, i32) {
    %c0_i32 = arith.constant 0 : i32
    %c0_i32_0 = arith.constant 0 : i32
    %c0_i32_1 = arith.constant 0 : i32
    return %c0_i32, %c0_i32_0 : i32, i32
  }
  func.func @transform_2(%arg0: i32, %arg1: memref<512xi32, #tpu.memory_space<smem>>) -> (i32, i32) {
    %c0_i32 = arith.constant 0 : i32
    %c0_i32_0 = arith.constant 0 : i32
    %c0_i32_1 = arith.constant 0 : i32
    return %c0_i32, %c0_i32_0 : i32, i32
  }
  func.func @transform_3(%arg0: i32, %arg1: memref<512xi32, #tpu.memory_space<smem>>) -> (i32, i32) {
    %c0_i32 = arith.constant 0 : i32
    %c0_i32_0 = arith.constant 0 : i32
    return %c0_i32, %arg0 : i32, i32
  }
}

</mosaic_0001>

<bundles_post_ra>
// kernel: tpu_custom_call.1
= control target key start
LH: loop header
LB: loop body
LE: loop exit
PB: predicated region body
PF: predicated region fallthrough
CT: control target
= control target key end

     0   :  { %s698_s20 = smov [#allocation3]   ;;  %s904_s0 = inlined_call_operand.hbm [shape: s32[512], index: 0, kind: input, shape index: {}]   ;;  %s905_s1 = inlined_call_operand.hbm [shape: f32[104,128], index: 1, kind: input, shape index: {}]   ;;  %s906_s2 = inlined_call_operand.vmem [shape: f32[2,128], index: 2, kind: input, shape index: {}]   ;;  %s907_s3 = inlined_call_operand.<no memory space> [shape: f32[1,1], index: 3, kind: input, shape index: {}]   ;;  %s908_s4 = inlined_call_operand.hbm [shape: f32[1,256], index: 4, kind: output, shape index: {}]  }
   0x1   :  { %910 = sst [smem:[#allocation13_spill]] %s905_s1  ;;  %s10_s17 = sshll.u32 %s904_s0, 4  ;;  %s11_s17 = int_to_ptr.hbm [resolvable:$true] %s10_s17 }
   0x2   :  { %911 = sst [smem:[#allocation14_spill]] %s906_s2 }
   0x3   :  { %14 = sst [smem:[#allocation4]] %s907_s3 }
   0x4   :  { %13 = dma.hbm_to_smem %s11_s17, 64, %s698_s20, [#allocation2] }
   0x5   :  { %664 = dma.done.wait [#allocation2], 64 }
   0x6   :  { %665 = vsyncadd [#allocation2], 4294967232 }
   0x7   :  { %17 = sfence }
   0x8   :  { %18 = vsyncpa [#allocation6], 0 }
   0x9   :  { %19 = vsyncpa [#allocation7], 0 }
   0xa   :  { %21 = vsyncpa [#allocation7 + $0x1], 0  ;;  %s733_s21 = smov 0   ;;  %s735_s22 = smov 0  }
   0xb   :  { %s737_s23 = smov 0   ;;  %s739_s0 = smov 0  }
   0xc LB: > { %s754_s3 = sadd.s32 4294967295, %s688_s0   ;;  %s487_s24 = sadd.s32 4294967294, %s688_s0   ;;  %s688_s0 = sphi %s739_s0, %s924_s0   ;;  %s684_s23 = sphi %s737_s23, %s923_s23   ;;  %s680_s22 = sphi %s735_s22, %s922_s22   ;;  %s676_s21 = sphi %s733_s21, %s921_s21  }
   0xd   : > { %s758_s25 = sadd.s32 1, %s688_s0   ;;  %s97_s26 = sadd.s32 1, %s684_s23 }
   0xe   : > { %s94_s27 = ssub.s32 %s688_s0, %s758_s25  ;;  %p107_p0 = scmp.ne.s32.totalorder %s684_s23, %s680_s22 }
   0xf   : > { %p95_p1 = scmp.eq.s32.totalorder %s94_s27, 0  ;;  %p108_p2 = scmp.eq.s32.totalorder %s754_s3, 1 }
  0x10   : > { %p113_p3 = scmp.ne.s32.totalorder %s680_s22, %s676_s21  ;;  %p114_p4 = scmp.eq.s32.totalorder %s487_s24, 1 }
  0x11   : > { %s769_s28 = scalar_select %p95_p1, %s684_s23, %s97_s26  }
  0x12   : > { %p771_p5 = por %p108_p2, %p107_p0  ;;  %p775_p6 = por %p114_p4, %p113_p3 }
  0x13   : > { %912 = sst [smem:[#allocation12_spill]] %s769_s28  ;;  %p488_p7 = scmp.ge.s32.totalorder %s688_s0, 1 }
  0x14   : > { %p121_p8 = scmp.lt.s32.totalorder %s688_s0, 3  ;;  %p511_p9 = scmp.eq.s32.totalorder %s754_s3, 0 }
  0x15   : > { %s915_s1 = sld [smem:[#allocation13_spill]]  ;;  %s699_s8 = smov [#allocation5]  }
  0x16   : > { %p122_p10 = pnand %p488_p7, %p121_p8  ;;  %s134_s9 = sshll.u32 %s699_s8, 4  ;;  %s135_s9 = int_to_ptr.vmem [resolvable:$true] %s134_s9 }
  0x17   : > { %s700_s10 = smov 128   ;;  %s701_s11 = smov 8  }
  0x18   : > { %p503_p11 = pneg %p122_p10  ;;  %156 = sbr.rel (%p122_p10) target bundleno = 251 (0xfb), region = 32 }
  0x1a   : > { %p504_p12 = pnand %p511_p9, %p503_p11 }
  0x1b   : > { %s132_s7 = sshll.u32 %s915_s1, 4  ;;  %s133_s7 = int_to_ptr.hbm [resolvable:$true] %s132_s7 }
  0x1c   : > { %506 = dma.hbm_to_vmem [thread:$0]  (!%p504_p12), %s133_s7, 1664, %s135_s9, [#allocation6], %s700_s10, %s700_s10, %s701_s11  }
  0x1d   : > { %667 = dma.done.wait (%p511_p9), [#allocation6], 1664  }
  0x1e   : > { %669 = vsyncadd (%p511_p9), [#allocation6], 4294965632  ;;  %s909_s12 = sand.u32 1, %s680_s22   ;;  %v179_v0 = vlaneseq  ;;  %s793_s14 = sld [smem:[#allocation4]]  ;;  %v811_v4 = vmov 0.0  }
  0x1f   : > { %s916_s2 = sld [smem:[#allocation14_spill]]  ;;  %s809_s19 = scalar_lea.vmem [#allocation8], %s909_s12 }
  0x20   : > { %v795_v1 = vand.u32 127, %v179_v0  ;;  %s813_s20 = smov 0  }
  0x25   : > { %v800_v2 = vld [vmem:[%s916_s2] sm:$0x1]  ;;  %v805_v3 = vld [vmem:[%s916_s2 + $0x1] sm:$0x1] }
  0x26 LB: >> { %s917_s13 = sshll.u32 %s754_s3, 3  ;;  %vm350_vm0 = vcmask 1040384   ;;  %s696_s20 = sphi %s813_s20, %s186_s20   ;;  %v692_v4 = vphi %v811_v4, %v918_v4  }
  0x27   : >> { %s188_s24 = sadd.s32 %s696_s20, %s917_s13 }
  0x28   : >> { %s824_s26 = sshll.u32 %s188_s24, 4 }
  0x29   : >> { %s190_s27 = sadd.s32 256, %s824_s26  ;;  %s191_s5 = sld [smem:[#allocation3 + %s824_s26]] }
  0x2a   : >> { %s192_s6 = sld [smem:[#allocation3 + %s190_s27]]  ;;  %s197_s7 = sadd.s32 1, %s824_s26 }
  0x2b   : >> { %s198_s8 = sld [smem:[#allocation3 + %s197_s7]]  ;;  %s199_s9 = sadd.s32 257, %s824_s26 }
  0x2c   : >> { %s200_s10 = sld [smem:[#allocation3 + %s199_s9]]  ;;  %s207_s11 = sadd.s32 2, %s824_s26 }
  0x2d   : >> { %s208_s15 = sld [smem:[#allocation3 + %s207_s11]]  ;;  %s209_s16 = sadd.s32 258, %s824_s26 }
  0x2e   : >> { %s210_s17 = sld [smem:[#allocation3 + %s209_s16]]  ;;  %s217_s18 = sadd.s32 3, %s824_s26 }
  0x2f   : >> { %s218_s24 = sld [smem:[#allocation3 + %s217_s18]]  ;;  %s193_s13 = scalar_lea.vmem [#allocation5], %s191_s5 }
  0x30   : >> { %v194_v5 = vld [vmem:[%s193_s13] sm:$0x1]  ;;  %s219_s12 = sadd.s32 259, %s824_s26  ;;  %s195_s1 = scalar_lea.vmem [#allocation5], %s192_s6 }
  0x31   : >> { %v196_v6 = vld [vmem:[%s195_s1] sm:$0x1]  ;;  %s220_s2 = sld [smem:[#allocation3 + %s219_s12]]  ;;  %s201_s28 = scalar_lea.vmem [#allocation5], %s198_s8 }
  0x32   : >> { %v202_v7 = vld [vmem:[%s201_s28] sm:$0x1]  ;;  %s227_s27 = sadd.s32 4, %s824_s26  ;;  %s204_s7 = scalar_lea.vmem [#allocation5], %s200_s10 }
  0x33   : >> { %v203_v8 = vmax.f32 %v194_v5, %v202_v7  ;;  %v205_v9 = vld [vmem:[%s204_s7] sm:$0x1]  ;;  %s228_s9 = sld [smem:[#allocation3 + %s227_s27]]  ;;  %s211_s11 = scalar_lea.vmem [#allocation5], %s208_s15 }
  0x34   : >> { %v206_v10 = vmax.f32 %v196_v6, %v205_v9  ;;  %v212_v11 = vld [vmem:[%s211_s11] sm:$0x1]  ;;  %s229_s5 = sadd.s32 260, %s824_s26  ;;  %s214_s13 = scalar_lea.vmem [#allocation5], %s210_s17 }
  0x35   : >> { %v213_v12 = vmax.f32 %v203_v8, %v212_v11  ;;  %v215_v13 = vld [vmem:[%s214_s13] sm:$0x1]  ;;  %s230_s6 = sld [smem:[#allocation3 + %s229_s5]]  ;;  %s221_s1 = scalar_lea.vmem [#allocation5], %s218_s24  ;;  %v354_v11 = vstv %s696_s20 }
  0x36   : >> { %v216_v14 = vmax.f32 %v206_v10, %v215_v13  ;;  %v222_v15 = vld [vmem:[%s221_s1] sm:$0x1]  ;;  %s237_s28 = sadd.s32 5, %s824_s26  ;;  %s239_s12 = sadd.s32 261, %s824_s26  ;;  %vm355_vm1 = vcmp.eq.s32.totalorder %v795_v1, %v354_v11 }
  0x37   : >> { %v223_v16 = vmax.f32 %v213_v12, %v222_v15  ;;  %s238_s8 = sld [smem:[#allocation3 + %s237_s28]]  ;;  %s224_s10 = scalar_lea.vmem [#allocation5], %s220_s2 }
  0x38   : >> { %v225_v17 = vld [vmem:[%s224_s10] sm:$0x1]  ;;  %s240_s15 = sld [smem:[#allocation3 + %s239_s12]]  ;;  %s247_s16 = sadd.s32 6, %s824_s26 }
  0x39   : >> { %v226_v18 = vmax.f32 %v216_v14, %v225_v17  ;;  %s248_s18 = sld [smem:[#allocation3 + %s247_s16]]  ;;  %s231_s17 = scalar_lea.vmem [#allocation5], %s228_s9 }
  0x3a   : >> { %v232_v19 = vld [vmem:[%s231_s17] sm:$0x1]  ;;  %s249_s27 = sadd.s32 262, %s824_s26  ;;  %s257_s7 = sadd.s32 7, %s824_s26 }
  0x3b   : >> { %v233_v20 = vmax.f32 %v223_v16, %v232_v19  ;;  %s250_s11 = sld [smem:[#allocation3 + %s249_s27]]  ;;  %s234_s24 = scalar_lea.vmem [#allocation5], %s230_s6 }
  0x3c   : >> { %v235_v21 = vld [vmem:[%s234_s24] sm:$0x1]  ;;  %s258_s5 = sld [smem:[#allocation3 + %s257_s7]]  ;;  %s259_s13 = sadd.s32 263, %s824_s26 }
  0x3d   : >> { %v236_v22 = vmax.f32 %v226_v18, %v235_v21  ;;  %s260_s2 = sld [smem:[#allocation3 + %s259_s13]]  ;;  %s241_s1 = scalar_lea.vmem [#allocation5], %s238_s8 }
  0x3e   : >> { %v242_v23 = vld [vmem:[%s241_s1] sm:$0x1]  ;;  %s267_s28 = sadd.s32 8, %s824_s26  ;;  %s244_s12 = scalar_lea.vmem [#allocation5], %s240_s15 }
  0x3f   : >> { %v243_v24 = vmax.f32 %v233_v20, %v242_v23  ;;  %v245_v25 = vld [vmem:[%s244_s12] sm:$0x1]  ;;  %s268_s9 = sld [smem:[#allocation3 + %s267_s28]]  ;;  %s251_s10 = scalar_lea.vmem [#allocation5], %s248_s18 }
  0x40   : >> { %v246_v26 = vmax.f32 %v236_v22, %v245_v25  ;;  %v252_v27 = vld [vmem:[%s251_s10] sm:$0x1]  ;;  %s269_s6 = sadd.s32 264, %s824_s26  ;;  %s277_s16 = sadd.s32 9, %s824_s26 }
  0x41   : >> { %v253_v28 = vmax.f32 %v243_v24, %v252_v27  ;;  %s270_s17 = sld [smem:[#allocation3 + %s269_s6]]  ;;  %s254_s27 = scalar_lea.vmem [#allocation5], %s250_s11 }
  0x42   : >> { %v255_v29 = vld [vmem:[%s254_s27] sm:$0x1]  ;;  %s278_s8 = sld [smem:[#allocation3 + %s277_s16]]  ;;  %s261_s7 = scalar_lea.vmem [#allocation5], %s258_s5 }
  0x43   : >> { %v256_v30 = vmax.f32 %v246_v26, %v255_v29  ;;  %v262_v31 = vld [vmem:[%s261_s7] sm:$0x1]  ;;  %s279_s15 = sadd.s32 265, %s824_s26  ;;  %s264_s24 = scalar_lea.vmem [#allocation5], %s260_s2 }
  0x44   : >> { %v263_v32 = vmax.f32 %v253_v28, %v262_v31  ;;  %v265_v33 = vld [vmem:[%s264_s24] sm:$0x1]  ;;  %s280_s13 = sld [smem:[#allocation3 + %s279_s15]]  ;;  %s287_s18 = sadd.s32 10, %s824_s26 }
  0x45   : >> { %v266_v34 = vmax.f32 %v256_v30, %v265_v33  ;;  %s288_s1 = sld [smem:[#allocation3 + %s287_s18]]  ;;  %s271_s28 = scalar_lea.vmem [#allocation5], %s268_s9 }
  0x46   : >> { %v272_v35 = vld [vmem:[%s271_s28] sm:$0x1]  ;;  %s289_s11 = sadd.s32 266, %s824_s26  ;;  %s297_s12 = sadd.s32 11, %s824_s26 }
  0x47   : >> { %v273_v36 = vmax.f32 %v263_v32, %v272_v35  ;;  %s290_s10 = sld [smem:[#allocation3 + %s289_s11]]  ;;  %s274_s6 = scalar_lea.vmem [#allocation5], %s270_s17 }
  0x48   : >> { %v275_v37 = vld [vmem:[%s274_s6] sm:$0x1]  ;;  %s298_s5 = sld [smem:[#allocation3 + %s297_s12]]  ;;  %s281_s2 = scalar_lea.vmem [#allocation5], %s278_s8 }
  0x49   : >> { %v276_v38 = vmax.f32 %v266_v34, %v275_v37  ;;  %v282_v39 = vld [vmem:[%s281_s2] sm:$0x1]  ;;  %s299_s16 = sadd.s32 267, %s824_s26  ;;  %s307_s27 = sadd.s32 12, %s824_s26 }
  0x4a   : >> { %v283_v40 = vmax.f32 %v273_v36, %v282_v39  ;;  %s300_s7 = sld [smem:[#allocation3 + %s299_s16]]  ;;  %s284_s15 = scalar_lea.vmem [#allocation5], %s280_s13 }
  0x4b   : >> { %v285_v41 = vld [vmem:[%s284_s15] sm:$0x1]  ;;  %s308_s9 = sld [smem:[#allocation3 + %s307_s27]]  ;;  %s291_s24 = scalar_lea.vmem [#allocation5], %s288_s1 }
  0x4c   : >> { %v286_v42 = vmax.f32 %v276_v38, %v285_v41  ;;  %v292_v43 = vld [vmem:[%s291_s24] sm:$0x1]  ;;  %s309_s17 = sadd.s32 268, %s824_s26  ;;  %s317_s18 = sadd.s32 13, %s824_s26 }
  0x4d   : >> { %v293_v44 = vmax.f32 %v283_v40, %v292_v43  ;;  %s310_s28 = sld [smem:[#allocation3 + %s309_s17]]  ;;  %s294_s11 = scalar_lea.vmem [#allocation5], %s290_s10 }
  0x4e   : >> { %v295_v45 = vld [vmem:[%s294_s11] sm:$0x1]  ;;  %s318_s8 = sld [smem:[#allocation3 + %s317_s18]]  ;;  %s301_s12 = scalar_lea.vmem [#allocation5], %s298_s5 }
  0x4f   : >> { %v296_v46 = vmax.f32 %v286_v42, %v295_v45  ;;  %v302_v47 = vld [vmem:[%s301_s12] sm:$0x1]  ;;  %s319_s13 = sadd.s32 269, %s824_s26  ;;  %s327_s6 = sadd.s32 14, %s824_s26 }
  0x50   : >> { %v303_v48 = vmax.f32 %v293_v44, %v302_v47  ;;  %s320_s2 = sld [smem:[#allocation3 + %s319_s13]]  ;;  %s304_s16 = scalar_lea.vmem [#allocation5], %s300_s7 }
  0x51   : >> { %v305_v49 = vld [vmem:[%s304_s16] sm:$0x1]  ;;  %s328_s1 = sld [smem:[#allocation3 + %s327_s6]]  ;;  %s311_s27 = scalar_lea.vmem [#allocation5], %s308_s9 }
  0x52   : >> { %v306_v50 = vmax.f32 %v296_v46, %v305_v49  ;;  %v312_v51 = vld [vmem:[%s311_s27] sm:$0x1]  ;;  %s329_s15 = sadd.s32 270, %s824_s26  ;;  %s337_s10 = sadd.s32 15, %s824_s26 }
  0x53   : >> { %v313_v52 = vmax.f32 %v303_v48, %v312_v51  ;;  %s330_s24 = sld [smem:[#allocation3 + %s329_s15]]  ;;  %s314_s17 = scalar_lea.vmem [#allocation5], %s310_s28 }
  0x54   : >> { %v315_v53 = vld [vmem:[%s314_s17] sm:$0x1]  ;;  %s338_s18 = sld [smem:[#allocation3 + %s337_s10]]  ;;  %s321_s5 = scalar_lea.vmem [#allocation5], %s318_s8 }
  0x55   : >> { %v316_v54 = vmax.f32 %v306_v50, %v315_v53  ;;  %v322_v55 = vld [vmem:[%s321_s5] sm:$0x1]  ;;  %s339_s11 = sadd.s32 271, %s824_s26  ;;  %s186_s20 = sadd.s32 1, %s696_s20  }
  0x56   : >> { %v323_v56 = vmax.f32 %v313_v52, %v322_v55  ;;  %s340_s12 = sld [smem:[#allocation3 + %s339_s11]]  ;;  %s324_s7 = scalar_lea.vmem [#allocation5], %s320_s2 }
  0x57   : >> { %v325_v57 = vld [vmem:[%s324_s7] sm:$0x1]  ;;  %s331_s13 = scalar_lea.vmem [#allocation5], %s328_s1  ;;  %p183_p13 = scmp.ge.s32.totalorder %s186_s20, 8  }
  0x58   : >> { %v326_v58 = vmax.f32 %v316_v54, %v325_v57  ;;  %v332_v59 = vld [vmem:[%s331_s13] sm:$0x1]  ;;  %v357_v14 = vstv (%p183_p13), %s793_s14  ;;  %s388_s14 = scalar_lea.hbm (%p183_p13), %s908_s4, %s754_s3  ;;  %s390_s8 = sshll.u32 (%p183_p13), %s809_s19, 4  ;;  %s391_s8 = int_to_ptr.vmem [resolvable:$true] %s390_s8 }
  0x59   : >> { %v333_v60 = vmax.f32 %v323_v56, %v332_v59  ;;  %s334_s9 = scalar_lea.vmem [#allocation5], %s330_s24  ;;  %s392_s2 = sshll.u32 (%p183_p13), %s388_s14, 4  ;;  %s393_s2 = int_to_ptr.hbm [resolvable:$true] %s392_s2 }
  0x5a   : >> { %v335_v61 = vld [vmem:[%s334_s9] sm:$0x1]  ;;  %s341_s6 = scalar_lea.vmem [#allocation5], %s338_s18  ;;  %s919_s16 = sand.u32 (%p183_p13), 1, %s680_s22  }
  0x5b   : >> { %v336_v62 = vmax.f32 %v326_v58, %v335_v61  ;;  %v342_v63 = vld [vmem:[%s341_s6] sm:$0x1]  ;;  %s380_s1 = scalar_lea.sflag (%p183_p13), [#allocation7], %s919_s16  ;;  %s626_s27 = sshra.s32 (%p183_p13), %s393_s2, 4  ;;  %s627_s27 = int_to_ptr.hbm [resolvable:$true] %s626_s27 }
  0x5c   : >> { %v343_v0 = vmax.f32 %v333_v60, %v342_v63  ;;  %s344_s28 = scalar_lea.vmem [#allocation5], %s340_s12  ;;  %s628_s15 = scalar_lea.hbm (%p183_p13), %s627_s27, 1 }
  0x5d   : >> { %v345_v5 = vld [vmem:[%s344_s28] sm:$0x1]  ;;  %p629_p0 = scmp.ne.s32.totalorder (%p183_p13), %s627_s27, %s628_s15  ;;  %s632_s24 = scalar_lea.hbm (%p183_p13), %s908_s4, 2 }
  0x5e   : >> { %v346_v6 = vmax.f32 %v336_v62, %v345_v5  ;;  %v347_v7 = vmul.f32 %v343_v0, %v800_v2  ;;  %p633_p3 = scmp.lt.s32.totalorder (%p183_p13), %s627_s27, %s908_s4  ;;  %p634_p4 = scmp.lt.s32.totalorder (%p183_p13), %s632_s24, %s628_s15 }
  0x5f   : > { %p630_p1 = pnand (%p183_p13), %p629_p0, %p771_p5 }
  0x60   : >> { %v348_v8 = vmul.f32 %v346_v6, %v805_v3  ;;  %p635_p7 = por (%p183_p13), %p634_p4, %p633_p3 }
  0x61   : > { %p631_p2 = pneg (%p183_p13), %p630_p1 }
  0x62   : >> { %v349_v9 = vadd.f32 %v348_v8, %v347_v7 }
  0x63   : > { %p636_p8 = pnand (%p183_p13), %p635_p7, %p631_p2 }
  0x64   : >> { %v351_v10 = vsel %vm350_vm0, %v349_v9, 0.0 }
  0x65   : >> { %352 = vadd.xlane.f32.xlu0 %v351_v10 }
  0xd6   : > { %185 = sbr.rel (!%p183_p13) target bundleno = 38 (0x26), region = 108 }
  0xd8   : >> { %v353_v12 = vpop.xlane.xlu0 %352 }
  0xd9   : >> { %v356_v13 = vsel %vm355_vm1, %v353_v12, %v692_v4  }
  0xda   : >> { %v918_v4 = vmov %v356_v13  ;;  %v358_v15 = vadd.f32 (%p183_p13), %v357_v14, %v356_v13 }
  0xdc   : > { %v494_v16 = vmul.f32 -1.442695, %v358_v15 }
  0xde   : > { %566 = vpow2.f32 %v494_v16 }
  0xe4   : > { %v567_v17 = vpop.eup %566 }
  0xe5   : > { %v362_v18 = vadd.f32 1.0, %v567_v17 }
  0xe7   : > { %568 = vrcp.f32 %v362_v18  ;;  %v374_v20 = vand.u32 2147483648, %v362_v18  ;;  %vm368_vm2 = vweird.f32 %v362_v18  ;;  %v372_v22 = vand.u32 2147483647, %v362_v18 }
  0xe9   : > { %v375_v2 = vor.u32 1.1754944e-38, %v374_v20  ;;  %vm373_vm5 = vcmp.eq.f32.partialorder %v372_v22, 8.507059e+37 }
  0xed   : > { %v569_v19 = vpop.eup %568 }
  0xee   : > { %v364_v4 = vmul.f32 %v569_v19, %v362_v18  ;;  %vm369_vm3 = vweird.f32 %v569_v19 }
  0xef   : > { %vm370_vm4 = vmor %vm368_vm2, %vm369_vm3 }
  0xf0   : > { %v365_v21 = vsub.f32 1.0, %v364_v4 }
  0xf2   : > { %v366_v1 = vmul.f32 %v569_v19, %v365_v21 }
  0xf4   : > { %v367_v3 = vadd.f32 %v569_v19, %v366_v1 }
  0xf6   : > { %v371_v23 = vsel %vm370_vm4, %v569_v19, %v367_v3 }
  0xf7   : > { %v376_v24 = vsel %vm373_vm5, %v375_v2, %v371_v23 }
  0xf8   : > { %378 = vst [vmem:[%s809_s19] sm:$0x1] %v376_v24 }
  0xf9   : > { %639 = shalt.err (!%p636_p8)
}
  0xfa   : > { %501 = dma.vmem_to_hbm [thread:$0]  (%p771_p5), %s391_s8, 16, %s393_s2, %s380_s1  }
  0xfb PF: > { %p513_p9 = scmp.ge.s32.totalorder %s688_s0, 2  ;;  %s404_s19 = sand.u32 1, %s676_s21  }
  0xfc   : > { %s405_s5 = scalar_lea.sflag [#allocation7], %s404_s19 }
  0xfd   : > { %p508_p10 = pnand %p513_p9, %p775_p6 }
  0xff   : > { %p509_p11 = pneg %p508_p10 }
 0x101   : > { %671 = dma.done.wait (%p509_p11), %s405_s5, 16  }
 0x102   : > { %673 = vsyncadd (%p509_p11), %s405_s5, 4294967280  ;;  %s920_s11 = sld [smem:[#allocation12_spill]]  ;;  %p24_p12 = scmp.ge.s32.totalorder %s758_s25, 4  }
 0x103   : > { %s921_s21 = smov %s680_s22  ;;  %s922_s22 = smov %s684_s23 }
 0x104   : > { %s924_s0 = smov %s758_s25  ;;  %26 = sbr.rel (!%p24_p12) target bundleno = 12 (0xc), region = 119 }
 0x108   : > { %s923_s23 = smov %s920_s11 }
 0x109   :  { %410 = vsyncpa [#allocation6], 1 }
 0x10a   :  { %412 = vsyncpa [#allocation6 + $0x1], 1 }
 0x10b   :  { %413 = vsyncpa [#allocation7], 1 }
 0x10c   :  { %415 = vsyncpa [#allocation7 + $0x1], 1 }

</bundles_post_ra>
